<compile_context>
chip_gen: v5e
topology: v5e:2x2
jax: 0.10.0
libtpu: 0.0.40
codegen_flags: <defaults>
</compile_context>

<pallas_src>
import jax
import jax.numpy as jnp
from jax import lax
from jax.experimental import pallas as pl
from jax.experimental.pallas import tpu as pltpu


def _domain_head_kernel(x_ref, w1_ref, b1_ref, w2t_ref, b2_ref, o_ref):
    # x:   (TB, D)
    # w1:  (D, H)       b1:  (1, H)
    # w2t: (N, H)       b2:  (1, N)        o: (TB, N)
    x = x_ref[...]

    # Linear(latent_dim -> 128) + ReLU
    h = jnp.dot(x, w1_ref[...], preferred_element_type=jnp.float32) + b1_ref[...]
    h = jnp.maximum(h, 0.0)

    # Linear(128 -> n_domain): contract h's feature axis against w2t's lane
    # axis (A @ B^T). Keeps the small-N weight lane-dense in VMEM.
    logits = lax.dot_general(
        h, w2t_ref[...],
        dimension_numbers=(((1,), (1,)), ((), ())),
        preferred_element_type=jnp.float32,
    ) + b2_ref[...]

    # Dropout(0.5): identity in eval mode.
    # Softmax(dim=1), numerically stable, exact division (1e-5 tolerance).
    m = jnp.max(logits, axis=-1, keepdims=True)
    e = jnp.exp(logits - m)
    s = jnp.sum(e, axis=-1, keepdims=True)
    o_ref[...] = (e / s).astype(o_ref.dtype)


def cnn_model_domain_forward(x, alpha, w1, b1, w2, b2, *, block_b=256):
    """Forward pass of cnn_model_domain.

    x:  (B, latent_dim) f32
    alpha: gradient-reversal coefficient (forward pass is identity => unused)
    w1: (latent_dim, 128)   b1: (128,)
    w2: (128, n_domain)     b2: (n_domain,)
    Returns (B, n_domain) softmax probabilities.
    """
    del alpha  # ReverseLayerF is identity in the forward pass.
    B, D = x.shape
    H = w1.shape[1]
    N = w2.shape[1]

    b1_2d = b1.reshape(1, H)
    b2_2d = b2.reshape(1, N)
    w2t = jnp.transpose(w2)  # (N, H): lane-dense layout for the small-N weight.

    tb = min(block_b, B)
    grid = (pl.cdiv(B, tb),)

    return pl.pallas_call(
        _domain_head_kernel,
        out_shape=jax.ShapeDtypeStruct((B, N), jnp.float32),
        grid_spec=pltpu.PrefetchScalarGridSpec(
            num_scalar_prefetch=0,
            grid=grid,
            in_specs=[
                pl.BlockSpec((tb, D), lambda i: (i, 0)),   # batch-tiled activations
                pl.BlockSpec((D, H), lambda i: (0, 0)),    # weights resident across grid
                pl.BlockSpec((1, H), lambda i: (0, 0)),
                pl.BlockSpec((N, H), lambda i: (0, 0)),
                pl.BlockSpec((1, N), lambda i: (0, 0)),
            ],
            out_specs=pl.BlockSpec((tb, N), lambda i: (i, 0)),
        ),
        compiler_params=pltpu.CompilerParams(
            dimension_semantics=("parallel",),  # batch blocks shard across TCs (v7x)
        ),
    )(x, w1, b1_2d, w2t, b2_2d)


def _reference(x, w1, b1, w2, b2):
    h = jnp.maximum(x @ w1 + b1.reshape(1, -1), 0.0)
    logits = h @ w2 + b2.reshape(1, -1)
    return jax.nn.softmax(logits, axis=1)


if __name__ == "__main__":
    latent_dim = 32
    hidden = 128          # fixed by the module definition
    n_domain = 4
    batch = 8
    alpha = 0.5

    key = jax.random.PRNGKey(0)
    kx, k1, k2, k3, k4 = jax.random.split(key, 5)

    x = jax.random.normal(kx, (batch, latent_dim), dtype=jnp.float32)
    w1 = jax.random.uniform(k1, (latent_dim, hidden), jnp.float32,
                            -1.0 / latent_dim ** 0.5, 1.0 / latent_dim ** 0.5)
    b1 = jax.random.uniform(k2, (hidden,), jnp.float32,
                            -1.0 / latent_dim ** 0.5, 1.0 / latent_dim ** 0.5)
    w2 = jax.random.uniform(k3, (hidden, n_domain), jnp.float32,
                            -1.0 / hidden ** 0.5, 1.0 / hidden ** 0.5)
    b2 = jax.random.uniform(k4, (n_domain,), jnp.float32,
                            -1.0 / hidden ** 0.5, 1.0 / hidden ** 0.5)

    out = cnn_model_domain_forward(x, alpha, w1, b1, w2, b2)
    out = jax.block_until_ready(out)

    ref = _reference(x, w1, b1, w2, b2)
    assert out.shape == (batch, n_domain)
    assert jnp.allclose(out, ref, atol=1e-5, rtol=1e-5), "mismatch vs reference"
    # rows should sum to 1
    assert jnp.allclose(jnp.sum(out, axis=1), jnp.ones((batch,)), atol=1e-5)

    print("KERNEL_OK")
</pallas_src>

<mosaic_0001>
module attributes {stable_mosaic.version = 11 : i64} {
  func.func @_domain_head_kernel(%arg0: i32, %arg1: memref<8x32xf32, #tpu.memory_space<vmem>>, %arg2: memref<32x128xf32, #tpu.memory_space<vmem>>, %arg3: memref<1x128xf32, #tpu.memory_space<vmem>>, %arg4: memref<4x128xf32, #tpu.memory_space<vmem>>, %arg5: memref<1x4xf32, #tpu.memory_space<vmem>>, %arg6: memref<8x4xf32, #tpu.memory_space<vmem>>) attributes {dimension_semantics = [#tpu.dimension_semantics<parallel>], iteration_bounds = array<i64: 1>, scalar_prefetch = 0 : i64, scratch_operands = 0 : i64, tpu.core_type = #tpu.core_type<tc>, window_params = [{transform_indices = @transform_0, window_bounds = array<i64: 8, 32>}, {pipeline_mode = #tpu.pipeline_mode<synchronous>, transform_indices = @transform_1, window_bounds = array<i64: 32, 128>}, {pipeline_mode = #tpu.pipeline_mode<synchronous>, transform_indices = @transform_2, window_bounds = array<i64: 1, 128>}, {pipeline_mode = #tpu.pipeline_mode<synchronous>, transform_indices = @transform_3, window_bounds = array<i64: 4, 128>}, {pipeline_mode = #tpu.pipeline_mode<synchronous>, transform_indices = @transform_4, window_bounds = array<i64: 1, 4>}, {transform_indices = @transform_5, window_bounds = array<i64: 8, 4>}]} {
    %c0 = arith.constant 0 : index
    %c0_0 = arith.constant 0 : index
    %0 = vector.load %arg1[%c0, %c0_0] : memref<8x32xf32, #tpu.memory_space<vmem>>, vector<8x32xf32>
    %c0_1 = arith.constant 0 : index
    %c0_2 = arith.constant 0 : index
    %1 = vector.load %arg2[%c0_1, %c0_2] : memref<32x128xf32, #tpu.memory_space<vmem>>, vector<32x128xf32>
    %cst = arith.constant dense<0.000000e+00> : vector<8x128xf32>
    %2 = tpu.matmul %0, %1, %cst {dimension_numbers = #tpu.dot_dimension_numbers<[1], [0], [0], [1], [0, 0, 1, 1], [], []>} : vector<8x32xf32>, vector<32x128xf32>, vector<8x128xf32> -> vector<8x128xf32>
    %c0_3 = arith.constant 0 : index
    %c0_4 = arith.constant 0 : index
    %3 = vector.load %arg3[%c0_3, %c0_4] : memref<1x128xf32, #tpu.memory_space<vmem>>, vector<1x128xf32>
    %4 = vector.broadcast %3 : vector<1x128xf32> to vector<8x128xf32>
    %5 = arith.addf %2, %4 : vector<8x128xf32>
    %cst_5 = arith.constant 0.000000e+00 : f32
    %6 = vector.broadcast %cst_5 : f32 to vector<8x128xf32>
    %7 = arith.maximumf %5, %6 : vector<8x128xf32>
    %c0_6 = arith.constant 0 : index
    %c0_7 = arith.constant 0 : index
    %8 = vector.load %arg4[%c0_6, %c0_7] : memref<4x128xf32, #tpu.memory_space<vmem>>, vector<4x128xf32>
    %cst_8 = arith.constant dense<0.000000e+00> : vector<8x4xf32>
    %9 = tpu.matmul %7, %8, %cst_8 {dimension_numbers = #tpu.dot_dimension_numbers<[1], [1], [0], [0], [0, 0, 1, 0], [], []>} : vector<8x128xf32>, vector<4x128xf32>, vector<8x4xf32> -> vector<8x4xf32>
    %c0_9 = arith.constant 0 : index
    %c0_10 = arith.constant 0 : index
    %10 = vector.load %arg5[%c0_9, %c0_10] : memref<1x4xf32, #tpu.memory_space<vmem>>, vector<1x4xf32>
    %11 = vector.broadcast %10 : vector<1x4xf32> to vector<8x4xf32>
    %12 = arith.addf %9, %11 : vector<8x4xf32>
    %cst_11 = arith.constant dense<0xFF800000> : vector<8xf32>
    %13 = vector.multi_reduction <maximumf>, %12, %cst_11 [1] : vector<8x4xf32> to vector<8xf32>
    %14 = vector.shape_cast %13 : vector<8xf32> to vector<8x1xf32>
    %15 = vector.broadcast %14 : vector<8x1xf32> to vector<8x4xf32>
    %16 = arith.subf %12, %15 : vector<8x4xf32>
    %17 = math.exp %16 : vector<8x4xf32>
    %cst_12 = arith.constant dense<0.000000e+00> : vector<8xf32>
    %18 = vector.multi_reduction <add>, %17, %cst_12 [1] : vector<8x4xf32> to vector<8xf32>
    %19 = vector.shape_cast %18 : vector<8xf32> to vector<8x1xf32>
    %20 = vector.broadcast %19 : vector<8x1xf32> to vector<8x4xf32>
    %21 = arith.divf %17, %20 : vector<8x4xf32>
    %c0_13 = arith.constant 0 : index
    %c0_14 = arith.constant 0 : index
    %22 = vector.load %arg6[%c0_13, %c0_14] : memref<8x4xf32, #tpu.memory_space<vmem>>, vector<8x4xf32>
    tpu.vector_store %arg6[%c0_13, %c0_14], %21 {strides = array<i32>} : memref<8x4xf32, #tpu.memory_space<vmem>>, vector<8x4xf32>,
    return
  }
  func.func @transform_0(%arg0: i32) -> (i32, i32) {
    %c0_i32 = arith.constant 0 : i32
    %c0_i32_0 = arith.constant 0 : i32
    return %arg0, %c0_i32 : i32, i32
  }
  func.func @transform_1(%arg0: i32) -> (i32, i32) {
    %c0_i32 = arith.constant 0 : i32
    %c0_i32_0 = arith.constant 0 : i32
    %c0_i32_1 = arith.constant 0 : i32
    return %c0_i32, %c0_i32_0 : i32, i32
  }
  func.func @transform_2(%arg0: i32) -> (i32, i32) {
    %c0_i32 = arith.constant 0 : i32
    %c0_i32_0 = arith.constant 0 : i32
    %c0_i32_1 = arith.constant 0 : i32
    return %c0_i32, %c0_i32_0 : i32, i32
  }
  func.func @transform_3(%arg0: i32) -> (i32, i32) {
    %c0_i32 = arith.constant 0 : i32
    %c0_i32_0 = arith.constant 0 : i32
    %c0_i32_1 = arith.constant 0 : i32
    return %c0_i32, %c0_i32_0 : i32, i32
  }
  func.func @transform_4(%arg0: i32) -> (i32, i32) {
    %c0_i32 = arith.constant 0 : i32
    %c0_i32_0 = arith.constant 0 : i32
    %c0_i32_1 = arith.constant 0 : i32
    return %c0_i32, %c0_i32_0 : i32, i32
  }
  func.func @transform_5(%arg0: i32) -> (i32, i32) {
    %c0_i32 = arith.constant 0 : i32
    %c0_i32_0 = arith.constant 0 : i32
    return %arg0, %c0_i32 : i32, i32
  }
}

</mosaic_0001>

<bundles_post_ra>
// kernel: tpu_custom_call.1
= control target key start
LH: loop header
LB: loop body
LE: loop exit
PB: predicated region body
PF: predicated region fallthrough
CT: control target
= control target key end

     0   :  { %10 = vsyncpa [#allocation3], 0  ;;  %s298_s0 = inlined_call_operand.hbm [shape: f32[8,32], index: 0, kind: input, shape index: {}]   ;;  %s299_s1 = inlined_call_operand.hbm [shape: f32[32,128], index: 1, kind: input, shape index: {}]   ;;  %s300_s2 = inlined_call_operand.vmem [shape: f32[1,128], index: 2, kind: input, shape index: {}]   ;;  %s301_s3 = inlined_call_operand.hbm [shape: f32[4,128], index: 3, kind: input, shape index: {}]   ;;  %s302_s4 = inlined_call_operand.vmem [shape: f32[1,4], index: 4, kind: input, shape index: {}]   ;;  %s303_s5 = inlined_call_operand.vmem [shape: f32[8,4], index: 5, kind: output, shape index: {}]  }
   0x1   :  { %11 = vsyncpa [#allocation5], 0  ;;  %s27_s20 = sshll.u32 %s299_s1, 4  ;;  %s242_s21 = smov [#allocation4]   ;;  %s28_s20 = int_to_ptr.hbm [resolvable:$true] %s27_s20 }
   0x2   :  { %s29_s22 = sshll.u32 %s242_s21, 4  ;;  %s17_s25 = sshll.u32 %s298_s0, 4  ;;  %s30_s22 = int_to_ptr.vmem [resolvable:$true] %s29_s22  ;;  %s18_s25 = int_to_ptr.hbm [resolvable:$true] %s17_s25 }
   0x3   :  { %s243_s26 = smov 128   ;;  %s244_s27 = smov 8  }
   0x4   :  { %35 = dma.hbm_to_vmem [thread:$0]  %s28_s20, 512, %s30_s22, [#allocation5], %s243_s26, %s243_s26, %s244_s27  }
   0x5   :  { %s245_s28 = smov [#allocation2]   ;;  %s43_s7 = sshll.u32 %s301_s3, 4  ;;  %s44_s7 = int_to_ptr.hbm [resolvable:$true] %s43_s7 }
   0x6   :  { %s19_s29 = sshll.u32 %s245_s28, 4  ;;  %s246_s1 = smov [#allocation6]   ;;  %s20_s29 = int_to_ptr.vmem [resolvable:$true] %s19_s29 }
   0x7   :  { %22 = dma.hbm_to_vmem [thread:$0]  %s18_s25, 128, %s20_s29, [#allocation3]  }
   0x8   :  { %s45_s8 = sshll.u32 %s246_s1, 4  ;;  %s46_s8 = int_to_ptr.vmem [resolvable:$true] %s45_s8 }
   0x9   :  { %48 = dma.hbm_to_vmem [thread:$0]  %s44_s7, 64, %s46_s8, [#allocation5]  }
   0xa   :  { %238 = dma.done.wait [#allocation3], 128  }
   0xb   :  { %239 = vsyncadd [#allocation3], 4294967168 }
   0xc   :  { %240 = dma.done.wait [#allocation5], 576  }
   0xd   :  { %241 = vsyncadd [#allocation5], 4294966720  ;;  %v67_v0 = vld [vmem:[#allocation4 + $0x18] sm:$0xff]  ;;  %v66_v1 = vld [vmem:[#allocation4 + $0x10] sm:$0xff]  ;;  %vm72_vm0 = vcmask 261120   ;;  %vm122_vm1 = vcmask 31744  }
   0xe   :  { %88 = vmatpush.msra.mxu0 %v67_v0  ;;  %v65_v2 = vld [vmem:[#allocation4 + $0x8] sm:$0xff]  ;;  %v64_v3 = vld [vmem:[#allocation4] sm:$0xff]  ;;  %v63_v4 = vld [vmem:[#allocation2] sm:$0xff] }
   0xf   :  { %v97_v5 = vld [vmem:[#allocation6] sm:$0xf]  ;;  %v160_v6 = vld [vmem:[%s300_s2] ss:$0 sm:$0xff] }
  0x10   :  { %89 = vmatpush.msra.mxu0 %v66_v1  ;;  %117 = vmatpush.xpose.msra.mxu1 %v97_v5  ;;  %v161_v10 = vld [vmem:[%s302_s4] ss:$0 sm:$0xff] }
  0x12   :  { %90 = vmatpush.msra.mxu0 %v65_v2 }
  0x14   :  { %91 = vmatpush.msra.mxu0 %v64_v3 }
  0x15   :  { %154 = vmatmul.msk.f32.vlgmr.msra.gmra.mxu0 %vm72_vm0, %v63_v4 }
  0x92   :  { %v93_v7 = vpop.f32.mrf.mxu0 }
  0x93   :  { %v94_v8 = vadd.f32 %v160_v6, %v93_v7 }
  0x95   :  { %v96_v9 = vmax.f32 %v94_v8, 0.0 }
  0x97   :  { %118 = vmatmul.f32.vlgmr.msra.gmra.mxu1 %v96_v9 }
 0x114   :  { %v119_v11 = vpop.f32.mrf.mxu1 }
 0x115   :  { %v120_v12 = vadd.f32 %v161_v10, %v119_v11 }
 0x117   :  { %v123_v13 = vsel %vm122_vm1, %v120_v12, -inf }
 0x118   :  { %124 = vmax.xlane.f32.xlu0 %v123_v13 }
 0x18b   :  { %v125_v14 = vpop.xlane.xlu0 %124 }
 0x18c   :  { %v126_v15 = vsub.f32 %v120_v12, %v125_v14 }
 0x18e   :  { %v127_v16 = vmul.f32 1.442695, %v126_v15 }
 0x190   :  { %162 = vpow2.f32 %v127_v16 }
 0x196   :  { %v163_v17 = vpop.eup %162 }
 0x197   :  { %v129_v18 = vsel %vm122_vm1, %v163_v17, 0.0 }
 0x198   :  { %130 = vadd.xlane.f32.xlu0 %v129_v18 }
 0x20b   :  { %v131_v19 = vpop.xlane.xlu0 %130 }
 0x20c   :  { %164 = vrcp.f32 %v131_v19  ;;  %v143_v23 = vand.u32 2147483648, %v131_v19  ;;  %v141_v25 = vand.u32 2147483647, %v131_v19  ;;  %vm137_vm3 = vweird.f32 %v131_v19 }
 0x20e   :  { %v144_v27 = vor.u32 1.1754944e-38, %v143_v23  ;;  %vm142_vm5 = vcmp.eq.f32.partialorder %v141_v25, 8.507059e+37 }
 0x212   :  { %v165_v20 = vpop.eup %164 }
 0x213   :  { %v133_v21 = vmul.f32 %v165_v20, %v131_v19  ;;  %vm138_vm2 = vweird.f32 %v165_v20 }
 0x214   :  { %vm139_vm4 = vmor %vm137_vm3, %vm138_vm2 }
 0x215   :  { %v134_v22 = vsub.f32 1.0, %v133_v21 }
 0x217   :  { %v135_v24 = vmul.f32 %v165_v20, %v134_v22 }
 0x219   :  { %v136_v26 = vadd.f32 %v165_v20, %v135_v24 }
 0x21b   :  { %v140_v28 = vsel %vm139_vm4, %v165_v20, %v136_v26 }
 0x21c   :  { %v145_v29 = vsel %vm142_vm5, %v144_v27, %v140_v28 }
 0x21d   :  { %v146_v30 = vmul.f32 %v163_v17, %v145_v29 }
 0x21f   :  { %147 = vst.msk [vmem:[%s303_s5] sm:$0xff] %vm122_vm1, %v146_v30 }
 0x220   :  { %152 = vsyncpa [#allocation3], 1 }
 0x221   :  { %153 = vsyncpa [#allocation5], 1 }

</bundles_post_ra>
